<compile_context>
chip_gen: v5e
topology: v5e:2x2
jax: 0.10.0
libtpu: 0.0.40
codegen_flags: <defaults>
</compile_context>

<pallas_src>
import functools

import jax
import jax.numpy as jnp
from jax.experimental import pallas as pl
from jax.experimental.pallas import tpu as pltpu

BN_EPS = 1e-5
_NEG_BIG = -1e30


def _fgen_kernel(x_ref, w1_ref, w2_ref, w3_ref, p_ref, o_ref, *, h1, h2, out_dim):
    """Fused Linear->BN->Linear->BN->Linear->Softmax (training-mode BN, batch stats).

    p_ref is the packed (8, 128) per-feature parameter slab:
      row 0: gamma1, row 1: beta1, row 2: gamma2, row 3: beta2, row 4: b3 (zero-padded).
    """
    x = x_ref[...]

    # ---- Linear 1 (bias dropped: exactly cancelled by BN mean subtraction) + BatchNorm1d ----
    h = jnp.dot(x, w1_ref[...], preferred_element_type=jnp.float32)
    mu = jnp.mean(h, axis=0, keepdims=True)
    var = jnp.mean(jnp.square(h - mu), axis=0, keepdims=True)   # biased var: PyTorch BN train mode
    scale = p_ref[0:1, 0:h1] * jax.lax.rsqrt(var + BN_EPS)      # gamma1 * rsqrt(var+eps)
    h = h * scale + (p_ref[1:2, 0:h1] - mu * scale)             # shift = beta1 - mu*scale

    # ---- Linear 2 (bias dropped) + BatchNorm1d ----
    h = jnp.dot(h, w2_ref[...], preferred_element_type=jnp.float32)
    mu = jnp.mean(h, axis=0, keepdims=True)
    var = jnp.mean(jnp.square(h - mu), axis=0, keepdims=True)
    scale = p_ref[2:3, 0:h2] * jax.lax.rsqrt(var + BN_EPS)
    h = h * scale + (p_ref[3:4, 0:h2] - mu * scale)

    # ---- Linear 3 (lane-padded to 128 cols) + Softmax(dim=1) over the valid lanes ----
    h = jnp.dot(h, w3_ref[...], preferred_element_type=jnp.float32) + p_ref[4:5, :]
    lane = jax.lax.broadcasted_iota(jnp.int32, h.shape, 1)
    h = jnp.where(lane < out_dim, h, _NEG_BIG)                  # padded lanes -> exp() == 0
    m = jnp.max(h, axis=1, keepdims=True)
    e = jnp.exp(h - m)
    o_ref[...] = (e / jnp.sum(e, axis=1, keepdims=True)).astype(o_ref.dtype)


def feature_generation_block(noise, params):
    """Feature_generation_block.forward(noise) -> (B, output_dim) softmax rows."""
    noise = noise.astype(jnp.float32)
    B = noise.shape[0]
    h1 = params["w1"].shape[1]
    h2 = params["w2"].shape[1]
    out_dim = params["out_dim"]
    out_pad = params["w3p"].shape[1]

    kernel = functools.partial(_fgen_kernel, h1=h1, h2=h2, out_dim=out_dim)
    vmem = pl.BlockSpec(memory_space=pltpu.MemorySpace.VMEM)
    y_pad = pl.pallas_call(
        kernel,
        out_shape=jax.ShapeDtypeStruct((B, out_pad), jnp.float32),
        in_specs=[vmem, vmem, vmem, vmem, vmem],
        out_specs=vmem,
    )(noise, params["w1"], params["w2"], params["w3p"], params["pslab"])
    return y_pad[:, :out_dim]


def init_feature_generation_block_params(key, input_dim, output_dim, lane=128):
    """Synthetic params, shapes per Feature_generation_block.__init__ (PyTorch defaults)."""
    dim_diff = output_dim // input_dim
    h1 = input_dim * dim_diff // 3
    h2 = input_dim * dim_diff // 3 * 2
    assert output_dim <= lane  # TODO(synk): tile the output lane axis if output_dim > 128

    ks = jax.random.split(key, 3)

    def lin(k, fan_in, fan_out):
        kw, kb = jax.random.split(k)
        bound = 1.0 / float(fan_in) ** 0.5
        w = jax.random.uniform(kw, (fan_in, fan_out), jnp.float32, -bound, bound)
        b = jax.random.uniform(kb, (fan_out,), jnp.float32, -bound, bound)
        return w, b

    w1, b1 = lin(ks[0], input_dim, h1)
    w2, b2 = lin(ks[1], h1, h2)
    w3, b3 = lin(ks[2], h2, output_dim)

    g1 = jnp.ones((h1,), jnp.float32)
    be1 = jnp.zeros((h1,), jnp.float32)
    g2 = jnp.ones((h2,), jnp.float32)
    be2 = jnp.zeros((h2,), jnp.float32)

    # lane-padded final weight (zero columns past output_dim)
    w3p = jnp.zeros((h2, lane), jnp.float32).at[:, :output_dim].set(w3)

    # pack per-feature vectors into one lane-dense (8, 128) slab (single unmasked DMA)
    pslab = jnp.zeros((8, lane), jnp.float32)
    pslab = pslab.at[0, :h1].set(g1)
    pslab = pslab.at[1, :h1].set(be1)
    pslab = pslab.at[2, :h2].set(g2)
    pslab = pslab.at[3, :h2].set(be2)
    pslab = pslab.at[4, :output_dim].set(b3)

    return {
        "w1": w1, "w2": w2, "w3p": w3p, "pslab": pslab, "out_dim": output_dim,
        # Kept only for the pure-JAX reference check: b1/b2 are mathematically cancelled
        # by training-mode BatchNorm, so they are never passed to the kernel.
        "b1": b1, "b2": b2, "w3": w3, "b3": b3,
        "g1": g1, "be1": be1, "g2": g2, "be2": be2,
    }


def _reference_forward(noise, params):
    """Pure-JAX reference with the exact PyTorch semantics (including the cancelled biases)."""
    def bn(h, g, be):
        mu = jnp.mean(h, axis=0, keepdims=True)
        var = jnp.mean(jnp.square(h - mu), axis=0, keepdims=True)
        return (h - mu) / jnp.sqrt(var + BN_EPS) * g + be

    h = bn(noise @ params["w1"] + params["b1"], params["g1"], params["be1"])
    h = bn(h @ params["w2"] + params["b2"], params["g2"], params["be2"])
    h = h @ params["w3"] + params["b3"]
    return jax.nn.softmax(h, axis=1)


if __name__ == "__main__":
    # Shapes consistent with the module: input_dim=12, output_dim=48 -> hidden 16, 32; batch=8
    B = 8
    input_dim = 12
    output_dim = 48

    root = jax.random.PRNGKey(0)
    k_noise, k_par = jax.random.split(root)

    noise = jax.random.normal(k_noise, (B, input_dim), jnp.float32)
    params = init_feature_generation_block_params(k_par, input_dim, output_dim)

    out = feature_generation_block(noise, params)
    jax.block_until_ready(out)

    assert out.shape == (B, output_dim)
    assert bool(jnp.all(jnp.isfinite(out)))
    # softmax rows sum to 1
    assert jnp.allclose(jnp.sum(out, axis=1), 1.0, atol=1e-4)
    # matches the exact PyTorch-semantics reference (with biases, un-folded BN, un-padded linear)
    ref = _reference_forward(noise, params)
    assert jnp.allclose(out, ref, atol=2e-5, rtol=1e-4)

    print("KERNEL_OK")
</pallas_src>

<mosaic_0001>
module attributes {stable_mosaic.version = 11 : i64} {
  func.func @_fgen_kernel(%arg0: memref<8x12xf32, #tpu.memory_space<vmem>>, %arg1: memref<12x16xf32, #tpu.memory_space<vmem>>, %arg2: memref<16x32xf32, #tpu.memory_space<vmem>>, %arg3: memref<32x128xf32, #tpu.memory_space<vmem>>, %arg4: memref<8x128xf32, #tpu.memory_space<vmem>>, %arg5: memref<8x128xf32, #tpu.memory_space<vmem>>) attributes {dimension_semantics = [], scalar_prefetch = 0 : i64, scratch_operands = 0 : i64, tpu.core_type = #tpu.core_type<tc>} {
    %c0 = arith.constant 0 : index
    %c0_0 = arith.constant 0 : index
    %0 = vector.load %arg0[%c0, %c0_0] : memref<8x12xf32, #tpu.memory_space<vmem>>, vector<8x12xf32>
    %c0_1 = arith.constant 0 : index
    %c0_2 = arith.constant 0 : index
    %1 = vector.load %arg1[%c0_1, %c0_2] : memref<12x16xf32, #tpu.memory_space<vmem>>, vector<12x16xf32>
    %cst = arith.constant dense<0.000000e+00> : vector<8x16xf32>
    %2 = tpu.matmul %0, %1, %cst {dimension_numbers = #tpu.dot_dimension_numbers<[1], [0], [0], [1], [0, 0, 1, 1], [], []>} : vector<8x12xf32>, vector<12x16xf32>, vector<8x16xf32> -> vector<8x16xf32>
    %cst_3 = arith.constant dense<0.000000e+00> : vector<16xf32>
    %3 = vector.multi_reduction <add>, %2, %cst_3 [0] : vector<8x16xf32> to vector<16xf32>
    %4 = vector.shape_cast %3 : vector<16xf32> to vector<1x16xf32>
    %cst_4 = arith.constant 8.000000e+00 : f32
    %5 = vector.broadcast %cst_4 : f32 to vector<1x16xf32>
    %6 = arith.divf %4, %5 : vector<1x16xf32>
    %7 = vector.broadcast %6 : vector<1x16xf32> to vector<8x16xf32>
    %8 = arith.subf %2, %7 : vector<8x16xf32>
    %9 = arith.mulf %8, %8 : vector<8x16xf32>
    %cst_5 = arith.constant dense<0.000000e+00> : vector<16xf32>
    %10 = vector.multi_reduction <add>, %9, %cst_5 [0] : vector<8x16xf32> to vector<16xf32>
    %11 = vector.shape_cast %10 : vector<16xf32> to vector<1x16xf32>
    %cst_6 = arith.constant 8.000000e+00 : f32
    %12 = vector.broadcast %cst_6 : f32 to vector<1x16xf32>
    %13 = arith.divf %11, %12 : vector<1x16xf32>
    %c0_7 = arith.constant 0 : index
    %c0_8 = arith.constant 0 : index
    %14 = vector.load %arg4[%c0_7, %c0_8] : memref<8x128xf32, #tpu.memory_space<vmem>>, vector<1x16xf32>
    %cst_9 = arith.constant 9.99999974E-6 : f32
    %15 = vector.broadcast %cst_9 : f32 to vector<1x16xf32>
    %16 = arith.addf %13, %15 : vector<1x16xf32>
    %17 = math.rsqrt %16 : vector<1x16xf32>
    %18 = arith.mulf %14, %17 : vector<1x16xf32>
    %19 = vector.broadcast %18 : vector<1x16xf32> to vector<8x16xf32>
    %20 = arith.mulf %2, %19 : vector<8x16xf32>
    %c1 = arith.constant 1 : index
    %c0_10 = arith.constant 0 : index
    %21 = vector.load %arg4[%c1, %c0_10] : memref<8x128xf32, #tpu.memory_space<vmem>>, vector<1x16xf32>
    %22 = arith.mulf %6, %18 : vector<1x16xf32>
    %23 = arith.subf %21, %22 : vector<1x16xf32>
    %24 = vector.broadcast %23 : vector<1x16xf32> to vector<8x16xf32>
    %25 = arith.addf %20, %24 : vector<8x16xf32>
    %c0_11 = arith.constant 0 : index
    %c0_12 = arith.constant 0 : index
    %26 = vector.load %arg2[%c0_11, %c0_12] : memref<16x32xf32, #tpu.memory_space<vmem>>, vector<16x32xf32>
    %cst_13 = arith.constant dense<0.000000e+00> : vector<8x32xf32>
    %27 = tpu.matmul %25, %26, %cst_13 {dimension_numbers = #tpu.dot_dimension_numbers<[1], [0], [0], [1], [0, 0, 1, 1], [], []>} : vector<8x16xf32>, vector<16x32xf32>, vector<8x32xf32> -> vector<8x32xf32>
    %cst_14 = arith.constant dense<0.000000e+00> : vector<32xf32>
    %28 = vector.multi_reduction <add>, %27, %cst_14 [0] : vector<8x32xf32> to vector<32xf32>
    %29 = vector.shape_cast %28 : vector<32xf32> to vector<1x32xf32>
    %cst_15 = arith.constant 8.000000e+00 : f32
    %30 = vector.broadcast %cst_15 : f32 to vector<1x32xf32>
    %31 = arith.divf %29, %30 : vector<1x32xf32>
    %32 = vector.broadcast %31 : vector<1x32xf32> to vector<8x32xf32>
    %33 = arith.subf %27, %32 : vector<8x32xf32>
    %34 = arith.mulf %33, %33 : vector<8x32xf32>
    %cst_16 = arith.constant dense<0.000000e+00> : vector<32xf32>
    %35 = vector.multi_reduction <add>, %34, %cst_16 [0] : vector<8x32xf32> to vector<32xf32>
    %36 = vector.shape_cast %35 : vector<32xf32> to vector<1x32xf32>
    %cst_17 = arith.constant 8.000000e+00 : f32
    %37 = vector.broadcast %cst_17 : f32 to vector<1x32xf32>
    %38 = arith.divf %36, %37 : vector<1x32xf32>
    %c2 = arith.constant 2 : index
    %c0_18 = arith.constant 0 : index
    %39 = vector.load %arg4[%c2, %c0_18] : memref<8x128xf32, #tpu.memory_space<vmem>>, vector<1x32xf32>
    %cst_19 = arith.constant 9.99999974E-6 : f32
    %40 = vector.broadcast %cst_19 : f32 to vector<1x32xf32>
    %41 = arith.addf %38, %40 : vector<1x32xf32>
    %42 = math.rsqrt %41 : vector<1x32xf32>
    %43 = arith.mulf %39, %42 : vector<1x32xf32>
    %44 = vector.broadcast %43 : vector<1x32xf32> to vector<8x32xf32>
    %45 = arith.mulf %27, %44 : vector<8x32xf32>
    %c3 = arith.constant 3 : index
    %c0_20 = arith.constant 0 : index
    %46 = vector.load %arg4[%c3, %c0_20] : memref<8x128xf32, #tpu.memory_space<vmem>>, vector<1x32xf32>
    %47 = arith.mulf %31, %43 : vector<1x32xf32>
    %48 = arith.subf %46, %47 : vector<1x32xf32>
    %49 = vector.broadcast %48 : vector<1x32xf32> to vector<8x32xf32>
    %50 = arith.addf %45, %49 : vector<8x32xf32>
    %c0_21 = arith.constant 0 : index
    %c0_22 = arith.constant 0 : index
    %51 = vector.load %arg3[%c0_21, %c0_22] : memref<32x128xf32, #tpu.memory_space<vmem>>, vector<32x128xf32>
    %cst_23 = arith.constant dense<0.000000e+00> : vector<8x128xf32>
    %52 = tpu.matmul %50, %51, %cst_23 {dimension_numbers = #tpu.dot_dimension_numbers<[1], [0], [0], [1], [0, 0, 1, 1], [], []>} : vector<8x32xf32>, vector<32x128xf32>, vector<8x128xf32> -> vector<8x128xf32>
    %c4 = arith.constant 4 : index
    %c0_24 = arith.constant 0 : index
    %53 = vector.load %arg4[%c4, %c0_24] : memref<8x128xf32, #tpu.memory_space<vmem>>, vector<1x128xf32>
    %54 = vector.broadcast %53 : vector<1x128xf32> to vector<8x128xf32>
    %55 = arith.addf %52, %54 : vector<8x128xf32>
    %56 = tpu.iota {dimensions = array<i32: 1>} : vector<8x128xi32>
    %c48_i32 = arith.constant 48 : i32
    %57 = vector.broadcast %c48_i32 : i32 to vector<8x128xi32>
    %58 = arith.cmpi slt, %56, %57 : vector<8x128xi32>
    %cst_25 = arith.constant -1.000000e+30 : f32
    %59 = vector.broadcast %cst_25 : f32 to vector<8x128xf32>
    %60 = arith.select %58, %55, %59 : vector<8x128xi1>, vector<8x128xf32>
    %cst_26 = arith.constant dense<0xFF800000> : vector<8xf32>
    %61 = vector.multi_reduction <maximumf>, %60, %cst_26 [1] : vector<8x128xf32> to vector<8xf32>
    %62 = vector.shape_cast %61 : vector<8xf32> to vector<8x1xf32>
    %63 = vector.broadcast %62 : vector<8x1xf32> to vector<8x128xf32>
    %64 = arith.subf %60, %63 : vector<8x128xf32>
    %65 = math.exp %64 : vector<8x128xf32>
    %cst_27 = arith.constant dense<0.000000e+00> : vector<8xf32>
    %66 = vector.multi_reduction <add>, %65, %cst_27 [1] : vector<8x128xf32> to vector<8xf32>
    %67 = vector.shape_cast %66 : vector<8xf32> to vector<8x1xf32>
    %68 = vector.broadcast %67 : vector<8x1xf32> to vector<8x128xf32>
    %69 = arith.divf %65, %68 : vector<8x128xf32>
    %c0_28 = arith.constant 0 : index
    %c0_29 = arith.constant 0 : index
    %70 = vector.load %arg5[%c0_28, %c0_29] : memref<8x128xf32, #tpu.memory_space<vmem>>, vector<8x128xf32>
    tpu.vector_store %arg5[%c0_28, %c0_29], %69 {strides = array<i32>} : memref<8x128xf32, #tpu.memory_space<vmem>>, vector<8x128xf32>,
    return
  }
}

</mosaic_0001>

<bundles_post_ra>
// kernel: tpu_custom_call.1
= control target key start
LH: loop header
LB: loop body
LE: loop exit
PB: predicated region body
PF: predicated region fallthrough
CT: control target
= control target key end

     0   :  { %10 = vsyncpa [#allocation3], 0  ;;  %s556_s0 = inlined_call_operand.hbm [shape: f32[8,12], index: 0, kind: input, shape index: {}]   ;;  %s557_s1 = inlined_call_operand.hbm [shape: f32[12,16], index: 1, kind: input, shape index: {}]   ;;  %s558_s2 = inlined_call_operand.hbm [shape: f32[16,32], index: 2, kind: input, shape index: {}]   ;;  %s559_s3 = inlined_call_operand.hbm [shape: f32[32,128], index: 3, kind: input, shape index: {}]   ;;  %s560_s4 = inlined_call_operand.hbm [shape: f32[8,128], index: 4, kind: input, shape index: {}]   ;;  %s561_s5 = inlined_call_operand.hbm [shape: f32[8,128], index: 5, kind: output, shape index: {}]  }
   0x1   :  { %11 = vsyncpa [#allocation6], 0 }
   0x2   :  { %12 = vsyncpa [#allocation9], 0  ;;  %s29_s20 = sshll.u32 %s557_s1, 4  ;;  %s30_s20 = int_to_ptr.hbm [resolvable:$true] %s29_s20 }
   0x3   :  { %13 = vsyncpa [#allocation4], 0  ;;  %s487_s21 = smov [#allocation5]   ;;  %s55_s25 = sshll.u32 %s559_s3, 4  ;;  %s56_s25 = int_to_ptr.hbm [resolvable:$true] %s55_s25 }
   0x4   :  { %s31_s22 = sshll.u32 %s487_s21, 4  ;;  %s488_s26 = smov 128   ;;  %s32_s22 = int_to_ptr.vmem [resolvable:$true] %s31_s22 }
   0x5   :  { %s489_s27 = smov 8   ;;  %s490_s28 = smov [#allocation8]  }
   0x6   :  { %37 = dma.hbm_to_vmem [thread:$0]  %s30_s20, 256, %s32_s22, [#allocation6], %s488_s26, %s488_s26, %s489_s27  }
   0x7   :  { %s57_s29 = sshll.u32 %s490_s28, 4  ;;  %s19_s7 = sshll.u32 %s556_s0, 4  ;;  %s58_s29 = int_to_ptr.vmem [resolvable:$true] %s57_s29  ;;  %s20_s7 = int_to_ptr.hbm [resolvable:$true] %s19_s7 }
   0x8   :  { %63 = dma.hbm_to_vmem [thread:$0]  %s56_s25, 512, %s58_s29, [#allocation9], %s488_s26, %s488_s26, %s489_s27  }
   0x9   :  { %s42_s9 = sshll.u32 %s558_s2, 4  ;;  %s491_s10 = smov [#allocation2]   ;;  %s43_s9 = int_to_ptr.hbm [resolvable:$true] %s42_s9 }
   0xa   :  { %s21_s11 = sshll.u32 %s491_s10, 4  ;;  %s492_s3 = smov [#allocation7]   ;;  %s22_s11 = int_to_ptr.vmem [resolvable:$true] %s21_s11 }
   0xb   :  { %24 = dma.hbm_to_vmem [thread:$0]  %s20_s7, 128, %s22_s11, [#allocation3]  }
   0xc   :  { %s44_s12 = sshll.u32 %s492_s3, 4  ;;  %s69_s15 = sshll.u32 %s560_s4, 4  ;;  %s45_s12 = int_to_ptr.vmem [resolvable:$true] %s44_s12  ;;  %s70_s15 = int_to_ptr.hbm [resolvable:$true] %s69_s15 }
   0xd   :  { %50 = dma.hbm_to_vmem [thread:$0]  %s43_s9, 256, %s45_s12, [#allocation6], %s488_s26, %s488_s26, %s489_s27  }
   0xe   :  { %s493_s0 = smov [#allocation10]  }
   0xf   :  { %s71_s16 = sshll.u32 %s493_s0, 4  ;;  %s72_s16 = int_to_ptr.vmem [resolvable:$true] %s71_s16 }
  0x10   :  { %74 = dma.hbm_to_vmem [thread:$0]  %s70_s15, 128, %s72_s16, [#allocation9]  }
  0x11   :  { %479 = dma.done.wait [#allocation3], 128  }
  0x12   :  { %480 = vsyncadd [#allocation3], 4294967168 }
  0x13   :  { %481 = dma.done.wait [#allocation6], 512  }
  0x14   :  { %482 = vsyncadd [#allocation6], 4294966784 }
  0x15   :  { %483 = dma.done.wait [#allocation9], 640  }
  0x16   :  { %484 = vsyncadd [#allocation9], 4294966656  ;;  %vm102_vm0 = vcmask 1043456   ;;  %v97_v0 = vld [vmem:[#allocation5 + $0x8] sm:$0xf]  ;;  %v96_v1 = vld [vmem:[#allocation5] sm:$0xff] }
  0x17   :  { %311 = vmatpush.msk.msra.mxu0 %vm102_vm0, %v97_v0  ;;  %v95_v2 = vld [vmem:[#allocation2] sm:$0xff]  ;;  %vm98_vm1 = vcmask 97280   ;;  %v494_v3 = vmov 8.0   ;;  %vm126_vm2 = vcmask 130048   ;;  %v172_v29 = vld [vmem:[#allocation7] sm:$0xff]  ;;  %vm197_vm7 = vcmask 261120  }
  0x18   :  { %325 = vrcp.f32 %v494_v3  ;;  %v173_v27 = vld [vmem:[#allocation7 + $0x8] sm:$0xff]  ;;  %v152_v37 = vld [vmem:[#allocation10] sm:$0x1]  ;;  %v167_v41 = vld [vmem:[#allocation10 + $0x1] sm:$0x1]  ;;  %s495_s2 = smov [#allocation11]  }
  0x19   :  { %121 = vmatpush.msra.mxu0 %v96_v1  ;;  %191 = vmatpush.msra.mxu1 %v173_v27  ;;  %v239_v63 = vld [vmem:[#allocation8 + $0x18] sm:$0xff]  ;;  %v238_v1 = vld [vmem:[#allocation8 + $0x10] sm:$0xff]  ;;  %v237_v3 = vld [vmem:[#allocation8 + $0x8] sm:$0xff]  ;;  %s297_s4 = sshll.u32 %s495_s2, 4  ;;  %s299_s19 = sshll.u32 %s561_s5, 4  ;;  %s298_s4 = int_to_ptr.vmem [resolvable:$true] %s297_s4  ;;  %s300_s19 = int_to_ptr.hbm [resolvable:$true] %s299_s19 }
  0x1a   :  { %312 = vmatmul.msk.f32.vlgmr.msra.gmra.mxu0 %vm98_vm1, %v95_v2  ;;  %257 = vmatpush.msra.mxu2 %v239_v63 }
  0x1b   :  { %192 = vmatpush.msra.mxu1 %v172_v29 }
  0x1c   :  { %258 = vmatpush.msra.mxu2 %v238_v1 }
  0x1e   :  { %v326_v4 = vpop.eup %325  ;;  %259 = vmatpush.msra.mxu2 %v237_v3 }
  0x1f   :  { %v135_v5 = vmul.f32 8.0, %v326_v4  ;;  %vm139_vm3 = vweird.f32 %v326_v4 }
  0x21   :  { %v136_v6 = vsub.f32 1.0, %v135_v5  ;;  %v236_v5 = vld [vmem:[#allocation8] sm:$0xff] }
  0x22   :  { %260 = vmatpush.msra.mxu2 %v236_v5 }
  0x23   :  { %v137_v10 = vmul.f32 %v326_v4, %v136_v6 }
  0x25   :  { %v138_v13 = vadd.f32 %v326_v4, %v137_v10 }
  0x27   :  { %v542_v16 = vsel %vm139_vm3, %v326_v4, %v138_v13  ;;  %v216_v13 = vld [vmem:[#allocation10 + $0x2] sm:$0x1] }
  0x97   :  { %v123_v7 = vpop.f32.mrf.mxu0 }
  0x98   :  { %v127_v8 = vsel %vm126_vm2, %v123_v7, 0.0 }
  0x99   :  { %v128_v9 = vrot.slane %v127_v8, 4 }
  0x9b   :  { %v129_v11 = vadd.f32 %v128_v9, %v127_v8 }
  0x9d   :  { %v130_v12 = vrot.slane %v129_v11, 2 }
  0x9f   :  { %v131_v14 = vadd.f32 %v130_v12, %v129_v11 }
  0xa1   :  { %v132_v15 = vrot.slane %v131_v14, 1 }
  0xa3   :  { %v133_v17 = vadd.f32 %v132_v15, %v131_v14 }
  0xa5   :  { %v141_v18 = vmul.f32 %v542_v16, %v133_v17 }
  0xa7   :  { %v142_v19 = vsub.f32 %v123_v7, %v141_v18 }
  0xa9   :  { %v143_v20 = vmul.f32 %v142_v19, %v142_v19 }
  0xab   :  { %v144_v21 = vsel %vm126_vm2, %v143_v20, 0.0 }
  0xac   :  { %v145_v22 = vrot.slane %v144_v21, 4 }
  0xae   :  { %v146_v23 = vadd.f32 %v145_v22, %v144_v21 }
  0xb0   :  { %v147_v24 = vrot.slane %v146_v23, 2 }
  0xb2   :  { %v148_v25 = vadd.f32 %v147_v24, %v146_v23  ;;  %v265_v24 = vlaneseq }
  0xb4   :  { %v149_v26 = vrot.slane %v148_v25, 1 }
  0xb6   :  { %v150_v28 = vadd.f32 %v149_v26, %v148_v25  ;;  %v266_v25 = vand.u32 127, %v265_v24  ;;  %v324_v26 = vld [vmem:[#allocation10 + $0x4] ss:$0 sm:$0xff] }
  0xb8   :  { %v151_v30 = vmul.f32 %v150_v28, %v542_v16  ;;  %vm267_vm11 = vcmp.lt.s32.totalorder %v266_v25, 48 }
  0xba   :  { %v153_v31 = vadd.f32 1e-05, %v151_v30 }
  0xbc   :  { %327 = vrsqrt.f32 %v153_v31  ;;  %vm160_vm5 = vweird.f32 %v153_v31 }
  0xc2   :  { %v328_v32 = vpop.eup %327 }
  0xc3   :  { %v155_v33 = vmul.f32 %v328_v32, %v153_v31  ;;  %vm161_vm4 = vweird.f32 %v328_v32 }
  0xc4   :  { %vm162_vm6 = vmor %vm160_vm5, %vm161_vm4 }
  0xc5   :  { %v156_v34 = vmul.f32 %v328_v32, %v155_v33 }
  0xc7   :  { %v157_v35 = vmul.f32 0.5, %v156_v34 }
  0xc9   :  { %v158_v36 = vsub.f32 1.5, %v157_v35 }
  0xcb   :  { %v159_v38 = vmul.f32 %v328_v32, %v158_v36 }
  0xcd   :  { %v163_v39 = vsel %vm162_vm6, %v328_v32, %v159_v38 }
  0xce   :  { %v164_v40 = vmul.f32 %v163_v39, %v152_v37 }
  0xd0   :  { %v165_v42 = vperm.slane %v164_v40, 0  ;;  %v168_v43 = vmul.f32 %v164_v40, %v141_v18  ;;  %v231_v18 = vld [vmem:[#allocation10 + $0x3] sm:$0x1] }
  0xd2   :  { %v169_v44 = vsub.f32 %v167_v41, %v168_v43  ;;  %v166_v45 = vmul.f32 %v165_v42, %v123_v7 }
  0xd4   :  { %v170_v46 = vperm.slane %v169_v44, 0 }
  0xd6   :  { %v171_v47 = vadd.f32 %v170_v46, %v166_v45 }
  0xd8   :  { %313 = vmatmul.msk.f32.vlgmr.msra.gmra.mxu1 %vm126_vm2, %v171_v47 }
 0x155   :  { %v194_v48 = vpop.f32.mrf.mxu1 }
 0x156   :  { %v198_v49 = vsel %vm197_vm7, %v194_v48, 0.0 }
 0x157   :  { %v199_v50 = vrot.slane %v198_v49, 4 }
 0x159   :  { %v200_v51 = vadd.f32 %v199_v50, %v198_v49 }
 0x15b   :  { %v201_v52 = vrot.slane %v200_v51, 2 }
 0x15d   :  { %v202_v53 = vadd.f32 %v201_v52, %v200_v51 }
 0x15f   :  { %v203_v54 = vrot.slane %v202_v53, 1 }
 0x161   :  { %v204_v55 = vadd.f32 %v203_v54, %v202_v53 }
 0x163   :  { %v205_v56 = vmul.f32 %v204_v55, %v542_v16 }
 0x165   :  { %v206_v57 = vsub.f32 %v194_v48, %v205_v56 }
 0x167   :  { %v207_v58 = vmul.f32 %v206_v57, %v206_v57 }
 0x169   :  { %v208_v59 = vsel %vm197_vm7, %v207_v58, 0.0 }
 0x16a   :  { %v209_v60 = vrot.slane %v208_v59, 4 }
 0x16c   :  { %v210_v61 = vadd.f32 %v209_v60, %v208_v59 }
 0x16e   :  { %v211_v62 = vrot.slane %v210_v61, 2 }
 0x170   :  { %v212_v0 = vadd.f32 %v211_v62, %v210_v61 }
 0x172   :  { %v213_v2 = vrot.slane %v212_v0, 1 }
 0x174   :  { %v214_v4 = vadd.f32 %v213_v2, %v212_v0 }
 0x176   :  { %v215_v6 = vmul.f32 %v214_v4, %v542_v16 }
 0x178   :  { %v217_v7 = vadd.f32 1e-05, %v215_v6 }
 0x17a   :  { %329 = vrsqrt.f32 %v217_v7  ;;  %vm224_vm9 = vweird.f32 %v217_v7 }
 0x180   :  { %v330_v8 = vpop.eup %329 }
 0x181   :  { %v219_v9 = vmul.f32 %v330_v8, %v217_v7  ;;  %vm225_vm8 = vweird.f32 %v330_v8 }
 0x182   :  { %vm226_vm10 = vmor %vm224_vm9, %vm225_vm8 }
 0x183   :  { %v220_v10 = vmul.f32 %v330_v8, %v219_v9 }
 0x185   :  { %v221_v11 = vmul.f32 0.5, %v220_v10 }
 0x187   :  { %v222_v12 = vsub.f32 1.5, %v221_v11 }
 0x189   :  { %v223_v14 = vmul.f32 %v330_v8, %v222_v12 }
 0x18b   :  { %v227_v15 = vsel %vm226_vm10, %v330_v8, %v223_v14 }
 0x18c   :  { %v228_v17 = vmul.f32 %v227_v15, %v216_v13 }
 0x18e   :  { %v229_v19 = vperm.slane %v228_v17, 0  ;;  %v232_v20 = vmul.f32 %v228_v17, %v205_v56 }
 0x190   :  { %v233_v21 = vsub.f32 %v231_v18, %v232_v20  ;;  %v230_v22 = vmul.f32 %v229_v19, %v194_v48 }
 0x192   :  { %v234_v16 = vperm.slane %v233_v21, 0 }
 0x194   :  { %v235_v23 = vadd.f32 %v234_v16, %v230_v22 }
 0x196   :  { %314 = vmatmul.msk.f32.vlgmr.msra.gmra.mxu2 %vm197_vm7, %v235_v23 }
 0x219   :  { %v262_v27 = vpop.f32.mrf.mxu2 }
 0x21a   :  { %v263_v28 = vadd.f32 %v324_v26, %v262_v27 }
 0x21c   :  { %v268_v29 = vsel %vm267_vm11, %v263_v28, -1e+30 }
 0x21d   :  { %269 = vmax.xlane.f32.xlu0 %v268_v29 }
 0x290   :  { %v270_v30 = vpop.xlane.xlu0 %269 }
 0x291   :  { %v271_v31 = vsub.f32 %v268_v29, %v270_v30 }
 0x293   :  { %v272_v32 = vmul.f32 1.442695, %v271_v31 }
 0x295   :  { %331 = vpow2.f32 %v272_v32 }
 0x29b   :  { %v332_v33 = vpop.eup %331 }
 0x29c   :  { %274 = vadd.xlane.f32.xlu0 %v332_v33 }
 0x30f   :  { %v275_v34 = vpop.xlane.xlu0 %274 }
 0x310   :  { %333 = vrcp.f32 %v275_v34  ;;  %v287_v38 = vand.u32 2147483648, %v275_v34  ;;  %v285_v40 = vand.u32 2147483647, %v275_v34  ;;  %vm281_vm13 = vweird.f32 %v275_v34 }
 0x312   :  { %v288_v42 = vor.u32 1.1754944e-38, %v287_v38  ;;  %vm286_vm15 = vcmp.eq.f32.partialorder %v285_v40, 8.507059e+37 }
 0x316   :  { %v334_v35 = vpop.eup %333 }
 0x317   :  { %v277_v36 = vmul.f32 %v334_v35, %v275_v34  ;;  %vm282_vm12 = vweird.f32 %v334_v35 }
 0x318   :  { %vm283_vm14 = vmor %vm281_vm13, %vm282_vm12 }
 0x319   :  { %v278_v37 = vsub.f32 1.0, %v277_v36 }
 0x31b   :  { %v279_v39 = vmul.f32 %v334_v35, %v278_v37 }
 0x31d   :  { %v280_v41 = vadd.f32 %v334_v35, %v279_v39 }
 0x31f   :  { %v284_v43 = vsel %vm283_vm14, %v334_v35, %v280_v41 }
 0x320   :  { %v289_v44 = vsel %vm286_vm15, %v288_v42, %v284_v43 }
 0x321   :  { %v290_v45 = vmul.f32 %v332_v33, %v289_v44 }
 0x323   :  { %291 = vst [vmem:[#allocation11] sm:$0xff] %v290_v45 }
 0x324   :  { %302 = dma.vmem_to_hbm [thread:$0]  %s298_s4, 128, %s300_s19, [#allocation4]  }
 0x325   :  { %485 = dma.done.wait [#allocation4], 128  }
 0x326   :  { %486 = vsyncadd [#allocation4], 4294967168 }
 0x327   :  { %307 = vsyncpa [#allocation3], 1 }
 0x328   :  { %308 = vsyncpa [#allocation6], 1 }
 0x329   :  { %309 = vsyncpa [#allocation9], 1 }
 0x32a   :  { %310 = vsyncpa [#allocation4], 1 }

</bundles_post_ra>
